<compile_context>
chip_gen: v7x
topology: tpu7x:2x2x1
jax: 0.10.0
libtpu: 0.0.40
codegen_flags: <defaults>
</compile_context>

<pallas_src>
import jax
import jax.numpy as jnp
from jax.experimental import pallas as pl
from jax.experimental.pallas import tpu as pltpu


def _brightness_kernel(factor_ref, x_ref, o_ref):
    # factor_ref: (B,) f32 in SMEM (scalar prefetch)
    # x_ref / o_ref: (1, rows_per_block, LANE) f32 block in VMEM
    b = pl.program_id(0)
    shift = factor_ref[b] - 1.0          # Kornia: adjust_brightness(x, factor - 1)
    o_ref[...] = jnp.clip(x_ref[...] + shift, 0.0, 1.0)


def random_brightness_pallas(x, factors):
    """x: (B, C, H, W) float32 in [0, 1]; factors: (B,) float32 sampled in [a, b]."""
    B, C, H, W = x.shape
    L = C * H * W

    LANE = 1024                     # lane-dense last dim (large multiple of 128)
    TARGET_ROWS = 512               # 512 * 1024 * 4B = 2 MiB per block

    n_rows = -(-L // LANE)          # ceil(L / LANE)
    if n_rows <= TARGET_ROWS:
        # One tile spans all rows of a sample; block dim == full array dim, so
        # the (8, 128) divisibility rule is satisfied even for small n_rows.
        rows_per_block = n_rows
        n_rows_padded = n_rows
    else:
        rows_per_block = TARGET_ROWS                     # multiple of 8
        n_rows_padded = -(-n_rows // rows_per_block) * rows_per_block
    padded_L = n_rows_padded * LANE

    x_flat = x.reshape(B, L)
    if padded_L != L:
        x_flat = jnp.pad(x_flat, ((0, 0), (0, padded_L - L)))
    x3 = x_flat.reshape(B, n_rows_padded, LANE)

    grid = (B, n_rows_padded // rows_per_block)
    block = (1, rows_per_block, LANE)

    grid_spec = pltpu.PrefetchScalarGridSpec(
        num_scalar_prefetch=1,
        grid=grid,
        in_specs=[pl.BlockSpec(block, lambda b, t, fac: (b, t, 0))],
        out_specs=pl.BlockSpec(block, lambda b, t, fac: (b, t, 0)),
    )

    out3 = pl.pallas_call(
        _brightness_kernel,
        out_shape=jax.ShapeDtypeStruct((B, n_rows_padded, LANE), x.dtype),
        grid_spec=grid_spec,
        compiler_params=pltpu.CompilerParams(
            dimension_semantics=("parallel", "parallel"),
            vmem_limit_bytes=32 * 1024 * 1024,
        ),
        cost_estimate=pl.CostEstimate(
            flops=3 * B * L,
            transcendentals=0,
            bytes_accessed=2 * B * L * 4,
        ),
    )(factors, x3)

    out_flat = out3.reshape(B, padded_L)[:, :L]
    return out_flat.reshape(B, C, H, W)


def random_brightness_ref(x, factors):
    # Pure-JAX reference for sanity checking.
    shift = (factors - 1.0)[:, None, None, None]
    return jnp.clip(x + shift, 0.0, 1.0)


if __name__ == "__main__":
    # Deterministic setup
    a, b = 0.8, 1.2                      # brightness=(a, b), p=1.0
    B, C, H, W = 2, 4, 16, 16

    key = jax.random.PRNGKey(0)
    k_img, k_fac = jax.random.split(key)

    x = jax.random.uniform(k_img, (B, C, H, W), dtype=jnp.float32)  # image in [0, 1]
    # Per-sample brightness factor ~ Uniform(a, b)  (p=1.0 => always applied)
    factors = jax.random.uniform(k_fac, (B,), dtype=jnp.float32, minval=a, maxval=b)

    out = random_brightness_pallas(x, factors)
    out = jax.block_until_ready(out)

    ref = random_brightness_ref(x, factors)
    assert out.shape == x.shape and out.dtype == x.dtype
    assert jnp.allclose(out, ref, atol=1e-6), "mismatch vs reference"

    print("KERNEL_OK")
</pallas_src>

<mosaic_0001>
module attributes {stable_mosaic.version = 11 : i64} {
  func.func @_brightness_kernel(%arg0: i32, %arg1: i32, %arg2: memref<2xf32, #tpu.memory_space<smem>>, %arg3: memref<1x1x1024xf32, #tpu.memory_space<vmem>>, %arg4: memref<1x1x1024xf32, #tpu.memory_space<vmem>>) attributes {dimension_semantics = [#tpu.dimension_semantics<parallel>, #tpu.dimension_semantics<parallel>], iteration_bounds = array<i64: 2, 1>, scalar_prefetch = 1 : i64, scratch_operands = 0 : i64, tpu.core_type = #tpu.core_type<tc>, window_params = [{transform_indices = @transform_0, window_bounds = array<i64: 1, 1, 1024>}, {transform_indices = @transform_1, window_bounds = array<i64: 1, 1, 1024>}]} {
    %0 = arith.index_cast %arg0 : i32 to index
    %1 = memref.load %arg2[%0] : memref<2xf32, #tpu.memory_space<smem>>
    %cst = arith.constant 1.000000e+00 : f32
    %2 = arith.subf %1, %cst : f32
    %c0 = arith.constant 0 : index
    %c0_0 = arith.constant 0 : index
    %c0_1 = arith.constant 0 : index
    %3 = vector.load %arg3[%c0, %c0_0, %c0_1] : memref<1x1x1024xf32, #tpu.memory_space<vmem>>, vector<1x1x1024xf32>
    %4 = vector.broadcast %2 : f32 to vector<1x1x1024xf32>
    %5 = arith.addf %3, %4 : vector<1x1x1024xf32>
    %cst_2 = arith.constant 0.000000e+00 : f32
    %cst_3 = arith.constant 1.000000e+00 : f32
    %6 = vector.broadcast %cst_2 : f32 to vector<1x1x1024xf32>
    %7 = arith.maximumf %6, %5 : vector<1x1x1024xf32>
    %8 = vector.broadcast %cst_3 : f32 to vector<1x1x1024xf32>
    %9 = arith.minimumf %8, %7 : vector<1x1x1024xf32>
    %c0_4 = arith.constant 0 : index
    %c0_5 = arith.constant 0 : index
    %c0_6 = arith.constant 0 : index
    %10 = vector.load %arg4[%c0_4, %c0_5, %c0_6] : memref<1x1x1024xf32, #tpu.memory_space<vmem>>, vector<1x1x1024xf32>
    tpu.vector_store %arg4[%c0_4, %c0_5, %c0_6], %9 {strides = array<i32>} : memref<1x1x1024xf32, #tpu.memory_space<vmem>>, vector<1x1x1024xf32>,
    return
  }
  func.func @transform_0(%arg0: i32, %arg1: i32, %arg2: memref<2xf32, #tpu.memory_space<smem>>) -> (i32, i32, i32) {
    %c0_i32 = arith.constant 0 : i32
    %c0_i32_0 = arith.constant 0 : i32
    return %arg0, %arg1, %c0_i32 : i32, i32, i32
  }
  func.func @transform_1(%arg0: i32, %arg1: i32, %arg2: memref<2xf32, #tpu.memory_space<smem>>) -> (i32, i32, i32) {
    %c0_i32 = arith.constant 0 : i32
    %c0_i32_0 = arith.constant 0 : i32
    return %arg0, %arg1, %c0_i32 : i32, i32, i32
  }
}

</mosaic_0001>

<bundles_post_ra>
// kernel: tpu_custom_call.1
= control target key start
LH: loop header
LB: loop body
LE: loop exit
PB: predicated region body
PF: predicated region fallthrough
CT: control target
= control target key end

     0   :  { %s675_s0 = inlined_call_operand.hbm [shape: f32[2], index: 0, kind: input, shape index: {}]   ;;  %s676_s1 = inlined_call_operand.hbm [shape: f32[2,1,1024], index: 1, kind: input, shape index: {}]   ;;  %s677_s2 = inlined_call_operand.hbm [shape: f32[2,1,1024], index: 2, kind: output, shape index: {}]  }
   0x1   :  { %s346_s11 = scalar_lea.hbm %s675_s0, 16 }
   0x2   :  { %p347_p0 = scmp.ne.s32.totalorder %s675_s0, %s346_s11  ;;  %p350_p1 = scmp.lt.u32.totalorder %s346_s11, %s675_s0 }
   0x4   :  { %p352_p2 = pnand %p350_p1, %p347_p0 }
   0x6   :  { %355 = shalt.err (!%p352_p2)  }
   0x7   :  { %s472_s16 = smov [#allocation3]  }
   0x8   :  { %8 = dma.hbm_to_smem %s675_s0, 16, %s472_s16, [#allocation2] }
   0x9   :  { %438 = dma.done.wait [#allocation2], 16 }
   0xa   :  { %439 = vsyncadd [#allocation2], 4294967280 }
   0xb   :  { %10 = sfence }
   0xc   :  { %11 = vsyncpa [#allocation5], 0 }
   0xd   :  { %13 = vsyncpa [#allocation5 + $0x1], 0 }
   0xe   :  { %14 = vsyncpa [#allocation6], 0 }
   0xf   :  { %16 = vsyncpa [#allocation6 + $0x1], 0  ;;  %s502_s19 = smov 0   ;;  %s504_s20 = smov 0  }
  0x10   :  { %s506_s21 = smov 0   ;;  %s508_s22 = smov 0  }
  0x11   :  { %s510_s23 = smov 0   ;;  %s512_s24 = smov 0  }
  0x12 LB: > { %s265_s0 = sadd.s32 4294967295, %s470_s24   ;;  %s266_s25 = sadd.s32 4294967294, %s470_s24   ;;  %s470_s24 = sphi %s512_s24, %s22_s24   ;;  %s466_s23 = sphi %s510_s23, %s693_s23   ;;  %s462_s22 = sphi %s508_s22, %s692_s22   ;;  %s458_s21 = sphi %s506_s21, %s691_s21   ;;  %s454_s20 = sphi %s504_s20, %s690_s20   ;;  %s450_s19 = sphi %s502_s19, %s689_s19  }
  0x13   : > { %s34_s26 = sadd.s32 1, %s466_s23  ;;  %s43_s27 = sadd.s32 1, %s458_s21 }
  0x14   : > { %p36_p3 = scmp.ge.s32.totalorder %s34_s26, 2  ;;  %p50_p4 = scmp.ne.s32.totalorder %s458_s21, %s454_s20 }
  0x15   : > { %p51_p5 = scmp.eq.s32.totalorder %s470_s24, 0  ;;  %p56_p6 = scmp.ne.s32.totalorder %s454_s20, %s450_s19 }
  0x16   : > { %s695_s26 = smov (%p36_p3, %s34_s26), 0  ;;  %p57_p8 = scmp.eq.s32.totalorder %s265_s0, 0 }
  0x17   : > { %p543_p7 = por %p51_p5, %p50_p4  ;;  %s38_s29 = ssub.s32 %s466_s23, %s695_s26 }
  0x18   : > { %p82_p9 = scmp.eq.s32.totalorder %s265_s0, 1  ;;  %p41_p10 = scmp.eq.s32.totalorder %s38_s29, 0 }
  0x19   : > { %p549_p11 = por %p57_p8, %p56_p6  ;;  %p88_p13 = scmp.eq.s32.totalorder %s266_s25, 1 }
  0x1a   : > { %p553_p12 = por %p82_p9, %p50_p4  ;;  %p295_p2 = scmp.lt.s32.totalorder %s470_s24, 2 }
  0x1b   : > { %s558_s4 = scalar_select %p41_p10, %s458_s21, %s43_s27  }
  0x1c   : > { %s681_s3 = scalar_select %p553_p12, 1, 0 }
  0x1d   : > { %p560_p0 = por %p88_p13, %p56_p6  ;;  %s108_s6 = sand.u32 1, %s458_s21  }
  0x1e   : > { %s269_s7 = sshll.u32 %s108_s6, 3  ;;  %s281_s8 = sshll.u32 %s466_s23, 7 }
  0x1f   : > { %s682_s5 = scalar_select %p560_p0, 1, 0 }
  0x20   : > { %s571_s11 = scalar_lea.hbm %s676_s1, %s281_s8  ;;  %s112_s12 = scalar_lea.vmem [#allocation4], %s269_s7 }
  0x21   : > { %s122_s13 = sshll.u32 %s112_s12, 4  ;;  %p577_p3 = pnand %p295_p2, %p543_p7  ;;  %s573_s13 = int_to_ptr.vmem [resolvable:$true] %s122_s13 }
  0x22   : > { %s109_s15 = scalar_lea.sflag [#allocation5], %s108_s6  ;;  %s356_s16 = scalar_lea.hbm %s571_s11, 128 }
  0x23   : > { %p357_p6 = scmp.ne.s32.totalorder %s571_s11, %s356_s16  ;;  %p358_p8 = pneg %p577_p3 }
  0x24   : > { %s361_s0 = scalar_lea.hbm %s676_s1, 256  ;;  %p362_p7 = scmp.lt.u32.totalorder %s571_s11, %s676_s1 }
  0x25   : > { %p359_p9 = pnand %p358_p8, %p357_p6  ;;  %p363_p13 = scmp.lt.u32.totalorder %s361_s0, %s356_s16 }
  0x26   : > { %p365_p1 = scmp.lt.u32.totalorder %s356_s16, %s571_s11 }
  0x27   : > { %p360_p10 = pneg %p359_p9  ;;  %p364_p2 = por %p363_p13, %p362_p7 }
  0x29   : > { %p366_p4 = por %p365_p1, %p364_p2 }
  0x2b   : > { %p367_p5 = pnand %p366_p4, %p360_p10 }
  0x2d   : > { %370 = shalt.err (!%p367_p5)
}
  0x2e   : > { %s371_s28 = scalar_lea.vmem %s573_s13, 128  ;;  %s473_s29 = smov [#allocation4]  }
  0x2f   : > { %p372_p6 = scmp.ne.s32.totalorder %s573_s13, %s371_s28  ;;  %s376_s6 = sshll.u32 %s473_s29, 4  ;;  %s377_s6 = int_to_ptr.vmem [resolvable:$false] %s376_s6 }
  0x30   : > { %s378_s7 = scalar_lea.vmem %s377_s6, 256  ;;  %p379_p12 = scmp.lt.s32.totalorder %s573_s13, %s377_s6 }
  0x31   : > { %p374_p9 = pnand %p372_p6, %p358_p8  ;;  %p380_p7 = scmp.lt.s32.totalorder %s378_s7, %s371_s28 }
  0x33   : > { %p375_p0 = pneg %p374_p9  ;;  %p381_p13 = por %p380_p7, %p379_p12 }
  0x35   : > { %p382_p1 = pnand %p381_p13, %p375_p0 }
  0x37   : > { %385 = shalt.err (!%p382_p1)
}
  0x38   : > { %290 = dma.hbm_to_vmem [thread:$0]  (!%p577_p3), %s571_s11, 128, %s573_s13, %s109_s15  }
  0x39   : > { %p684_p4 = scmp.lt.s32.totalorder %s470_s24, 3  ;;  %p685_p5 = scmp.ge.s32.totalorder %s470_s24, 1 }
  0x3b   : > { %p128_p8 = pnand %p685_p5, %p684_p4 }
  0x3c   : > { %s613_s8 = sand.u32 (!%p128_p8), 1, %s454_s20  }
  0x3d   : > { %131 = sbr.rel (%p128_p8) target bundleno = 98 (0x62), region = 24  ;;  %s273_s9 = sshll.u32 (!%p128_p8), %s613_s8, 3 }
  0x3e   : > { %s134_s10 = scalar_lea.sflag (!%p128_p8), [#allocation5], %s613_s8  ;;  %s137_s12 = scalar_lea.vmem (!%p128_p8), [#allocation4], %s273_s9 }
  0x44   : > { %441 = dma.done.wait (%p549_p11), %s134_s10, 128  }
  0x45   : > { %443 = vsyncadd (%p549_p11), %s134_s10, 4294967168  ;;  %s156_s11 = sld [smem:[#allocation3 + %s462_s22]]  ;;  %v158_v0 = vld [vmem:[%s137_s12] sm:$0xff]  ;;  %s155_s14 = scalar_lea.vmem [#allocation7], %s273_s9 }
  0x46   : > { %s181_s15 = sshll.u32 %s155_s14, 4  ;;  %s282_s16 = sshll.u32 %s462_s22, 7  ;;  %s623_s15 = int_to_ptr.vmem [resolvable:$true] %s181_s15 }
  0x47   : > { %s628_s30 = scalar_lea.hbm %s677_s2, %s282_s16  ;;  %s165_s0 = scalar_lea.sflag [#allocation6], %s613_s8 }
  0x48   : > { %s386_s25 = scalar_lea.vmem %s623_s15, 128  ;;  %p686_p12 = scmp.ne.s32.totalorder %s681_s3, 0 }
  0x49   : > { %p387_p11 = scmp.ne.s32.totalorder %s623_s15, %s386_s25  ;;  %s474_s22 = smov [#allocation7]  }
  0x4a   : > { %s390_s27 = sshll.u32 %s474_s22, 4  ;;  %s391_s27 = int_to_ptr.vmem [resolvable:$false] %s390_s27 }
  0x4b   : > { %s275_s13 = sadd.f32 -1.0, %s156_s11  ;;  %p388_p0 = pnand %p387_p11, %p686_p12 }
  0x4c   : > { %s392_s28 = scalar_lea.vmem %s391_s27, 256  ;;  %p393_p10 = scmp.lt.s32.totalorder %s623_s15, %s391_s27 }
  0x4d   : > { %v159_v1 = vstv %s275_s13  ;;  %p389_p3 = pneg %p388_p0  ;;  %p394_p2 = scmp.lt.s32.totalorder %s392_s28, %s386_s25 }
  0x4e   : > { %v160_v2 = vadd.f32 %v159_v1, %v158_v0 }
  0x4f   : > { %p395_p6 = por %p394_p2, %p393_p10 }
  0x50   : > { %v161_v3 = vmax.f32 %v160_v2, 0.0 }
  0x51   : > { %p396_p9 = pnand %p395_p6, %p389_p3 }
  0x52   : > { %v162_v4 = vmin.f32 %v161_v3, 1.0 }
  0x54   : > { %163 = vst [vmem:[%s155_s14] sm:$0xff] %v162_v4 }
  0x55   : > { %399 = shalt.err (!%p396_p9)
}
  0x56   : > { %s400_s29 = scalar_lea.hbm %s628_s30, 128  ;;  %s404_s8 = scalar_lea.hbm %s677_s2, 256 }
  0x57   : > { %p401_p7 = scmp.ne.s32.totalorder %s628_s30, %s400_s29  ;;  %p405_p4 = scmp.lt.u32.totalorder %s628_s30, %s677_s2 }
  0x58   : > { %p406_p5 = scmp.lt.u32.totalorder %s404_s8, %s400_s29  ;;  %p408_p11 = scmp.lt.u32.totalorder %s400_s29, %s628_s30 }
  0x59   : > { %p402_p13 = pnand %p401_p7, %p686_p12 }
  0x5a   : > { %p407_p8 = por %p406_p5, %p405_p4 }
  0x5b   : > { %p403_p1 = pneg %p402_p13 }
  0x5c   : > { %p409_p0 = por %p408_p11, %p407_p8 }
  0x5e   : > { %p410_p3 = pnand %p409_p0, %p403_p1 }
  0x60   : > { %413 = shalt.err (!%p410_p3)
}
  0x61   : > { %285 = dma.vmem_to_hbm [thread:$0]  (%p686_p12), %s623_s15, 128, %s628_s30, %s165_s0  }
  0x62 PF: > { %s193_s12 = sand.u32 1, %s450_s19   ;;  %p687_p10 = scmp.ne.s32.totalorder %s682_s5, 0 }
  0x63   : > { %p688_p2 = scmp.ge.s32.totalorder %s470_s24, 2  ;;  %s194_s11 = scalar_lea.sflag [#allocation6], %s193_s12 }
  0x65   : > { %p292_p6 = pnand %p688_p2, %p687_p10 }
  0x67   : > { %445 = dma.done.wait (!%p292_p6), %s194_s11, 128  }
  0x68   : > { %447 = vsyncadd (!%p292_p6), %s194_s11, 4294967168  ;;  %s22_s24 = sadd.s32 1, %s470_s24   ;;  %s689_s19 = smov %s454_s20 }
  0x69   : > { %p19_p9 = scmp.ge.s32.totalorder %s22_s24, 4   ;;  %s690_s20 = smov %s458_s21 }
  0x6a   : > { %s691_s21 = smov %s558_s4  ;;  %s692_s22 = smov %s466_s23 }
  0x6b   : > { %s693_s23 = smov %s695_s26  ;;  %21 = sbr.rel (!%p19_p9) target bundleno = 18 (0x12), region = 69 }
  0x72   :  { %199 = vsyncpa [#allocation5], 1 }
  0x73   :  { %201 = vsyncpa [#allocation5 + $0x1], 1 }
  0x74   :  { %202 = vsyncpa [#allocation6], 1 }
  0x75   :  { %204 = vsyncpa [#allocation6 + $0x1], 1 }

</bundles_post_ra>
